<compile_context>
chip_gen: v5e
topology: v5e:2x2
jax: 0.10.0
libtpu: 0.0.40
codegen_flags: <defaults>
</compile_context>

<pallas_src>
import functools

import jax
import jax.numpy as jnp
from jax.experimental import pallas as pl
from jax.experimental.pallas import tpu as pltpu


def _round_up(x, n):
    return ((x + n - 1) // n) * n


def _lora_kernel(x_ref, wT_ref, b_ref, aT_ref, bupT_ref, o_ref, acc_ref, down_ref):
    # x_ref:    (tm, tk)        input tile
    # wT_ref:   (tk, tn)        pre-transposed frozen weight tile
    # b_ref:    (1, tn)         bias tile
    # aT_ref:   (tk, rank_p)    pre-transposed down-proj tile
    # bupT_ref: (rank_p, tn)    pre-transposed (and pre-scaled) up-proj tile
    # o_ref:    (tm, tn)        output tile
    # acc_ref:  (tm, tn) f32    main-matmul accumulator (scratch)
    # down_ref: (tm, rank_p) f32  LoRA down-proj accumulator (scratch)
    j = pl.program_id(1)
    k = pl.program_id(2)
    nk = pl.num_programs(2)

    @pl.when(k == 0)
    def _():
        acc_ref[...] = jnp.zeros_like(acc_ref)

    x = x_ref[...]

    # Frozen linear: accumulate x_tile @ W^T_tile on the MXU (f32 accumulation).
    acc_ref[...] += jnp.dot(x, wT_ref[...], preferred_element_type=jnp.float32)

    # LoRA down-projection: only needs to be computed once per row tile.
    # j == 0 is always the first column pass for a given i on the executing
    # core (N axis is "arbitrary", i.e. sequential), so the scratch value is
    # valid for all later j of the same i.
    @pl.when(j == 0)
    def _():
        @pl.when(k == 0)
        def _():
            down_ref[...] = jnp.zeros_like(down_ref)

        down_ref[...] += jnp.dot(x, aT_ref[...], preferred_element_type=jnp.float32)

    # Finalize this (i, j) output tile after the last K step.
    @pl.when(k == nk - 1)
    def _():
        up = jnp.dot(
            down_ref[...].astype(bupT_ref.dtype),
            bupT_ref[...],
            preferred_element_type=jnp.float32,
        )
        o_ref[...] = (acc_ref[...] + b_ref[...] + up).astype(o_ref.dtype)


def lora_forward(x, w, b, a_down, b_up, scaling, *, tm=256, tn=256, tk=512):
    """LoRA(nn.Linear) forward.

    x:      (batch, seq, d_in)
    w:      (d_out, d_in)   frozen nn.Linear weight
    b:      (d_out,)        frozen nn.Linear bias
    a_down: (rank, d_in)    adapter_down_proj.weight
    b_up:   (d_out, rank)   adapter_up_proj.weight (zero-init in the module)
    Returns (batch, seq, d_out).
    """
    batch, seq, d_in = x.shape
    d_out = w.shape[0]
    rank = a_down.shape[0]
    m = batch * seq
    dtype = x.dtype

    # ---- one-time host-side weight prep (no in-kernel transposes) ----------
    wT = jnp.asarray(w, dtype).T                                    # (d_in, d_out)
    aT = jnp.asarray(a_down, dtype).T                               # (d_in, rank)
    bupT = (jnp.asarray(b_up, jnp.float32) * scaling).astype(dtype).T  # (rank, d_out)
    b2 = jnp.asarray(b, dtype).reshape(1, d_out)

    # ---- tile sizes: sublane(8)/lane(128)-aligned, shrunk for tiny shapes ---
    tm = min(tm, _round_up(m, 8))
    tn = min(tn, _round_up(d_out, 128))
    tk = min(tk, _round_up(d_in, 128))
    rank_p = _round_up(rank, 128)

    m_p = _round_up(m, tm)
    n_p = _round_up(d_out, tn)
    k_p = _round_up(d_in, tk)

    # ---- zero-pad to the tile grid (sliced back after the call) ------------
    x2 = jnp.pad(x.reshape(m, d_in), ((0, m_p - m), (0, k_p - d_in)))
    wTp = jnp.pad(wT, ((0, k_p - d_in), (0, n_p - d_out)))
    aTp = jnp.pad(aT, ((0, k_p - d_in), (0, rank_p - rank)))
    bupTp = jnp.pad(bupT, ((0, rank_p - rank), (0, n_p - d_out)))
    b2p = jnp.pad(b2, ((0, 0), (0, n_p - d_out)))

    grid = (m_p // tm, n_p // tn, k_p // tk)

    out = pl.pallas_call(
        _lora_kernel,
        out_shape=jax.ShapeDtypeStruct((m_p, n_p), dtype),
        grid_spec=pltpu.PrefetchScalarGridSpec(
            num_scalar_prefetch=0,
            grid=grid,
            in_specs=[
                pl.BlockSpec((tm, tk), lambda i, j, k: (i, k)),       # x
                pl.BlockSpec((tk, tn), lambda i, j, k: (k, j)),       # W^T
                pl.BlockSpec((1, tn), lambda i, j, k: (0, j)),        # bias
                pl.BlockSpec((tk, rank_p), lambda i, j, k: (k, 0)),   # A^T
                pl.BlockSpec((rank_p, tn), lambda i, j, k: (0, j)),   # B_up^T (scaled)
            ],
            out_specs=pl.BlockSpec((tm, tn), lambda i, j, k: (i, j)),
            scratch_shapes=[
                pltpu.VMEM((tm, tn), jnp.float32),       # main accumulator
                pltpu.VMEM((tm, rank_p), jnp.float32),   # down-proj accumulator
            ],
        ),
        compiler_params=pltpu.CompilerParams(
            # N must stay sequential: the down-proj scratch is carried across j.
            dimension_semantics=("parallel", "arbitrary", "arbitrary"),
            vmem_limit_bytes=48 * 1024 * 1024,
        ),
    )(x2, wTp, b2p, aTp, bupTp)

    return out[:m, :d_out].reshape(batch, seq, d_out)


def lora_reference(x, w, b, a_down, b_up, scaling):
    pre = jnp.einsum("bsi,oi->bso", x, w) + b
    lora = jnp.einsum("bsr,or->bso", jnp.einsum("bsi,ri->bsr", x, a_down), b_up)
    return pre + lora * scaling


def _run_case(key, batch, seq, d_in, d_out, rank, alpha, zero_up):
    scaling = alpha / rank
    kx, kw, kb, ka, ku = jax.random.split(key, 5)
    x = jax.random.normal(kx, (batch, seq, d_in), dtype=jnp.float32)
    w = jax.random.normal(kw, (d_out, d_in), dtype=jnp.float32) * 0.1
    b = jax.random.normal(kb, (d_out,), dtype=jnp.float32) * 0.1
    a_down = jax.random.normal(ka, (rank, d_in), dtype=jnp.float32) * 0.1
    if zero_up:
        b_up = jnp.zeros((d_out, rank), dtype=jnp.float32)  # module's zero init
    else:
        b_up = jax.random.normal(ku, (d_out, rank), dtype=jnp.float32) * 0.1

    out = jax.block_until_ready(lora_forward(x, w, b, a_down, b_up, scaling))
    ref = lora_reference(x, w, b, a_down, b_up, scaling)
    assert out.shape == ref.shape
    assert jnp.allclose(out, ref, atol=1e-5, rtol=1e-5)


if __name__ == "__main__":
    key = jax.random.PRNGKey(0)
    k0, k1, k2 = jax.random.split(key, 3)

    # Small shapes consistent with the module's forward (batch, seq, hidden),
    # zero-initialized up-proj exactly like the PyTorch module.
    _run_case(k0, batch=2, seq=8, d_in=32, d_out=32, rank=4, alpha=1.0, zero_up=True)

    # Exercise the (otherwise zero) LoRA path with a nonzero up-projection.
    _run_case(k1, batch=2, seq=8, d_in=32, d_out=32, rank=4, alpha=1.0, zero_up=False)

    # Ragged / non-aligned shapes exercise the pad-and-slice tail handling.
    _run_case(k2, batch=3, seq=7, d_in=40, d_out=48, rank=3, alpha=2.0, zero_up=False)

    print("KERNEL_OK")
</pallas_src>

<mosaic_0001>
module attributes {stable_mosaic.version = 11 : i64} {
  func.func @_lora_kernel(%arg0: i32, %arg1: i32, %arg2: i32, %arg3: memref<16x128xf32, #tpu.memory_space<vmem>>, %arg4: memref<128x128xf32, #tpu.memory_space<vmem>>, %arg5: memref<1x128xf32, #tpu.memory_space<vmem>>, %arg6: memref<128x128xf32, #tpu.memory_space<vmem>>, %arg7: memref<128x128xf32, #tpu.memory_space<vmem>>, %arg8: memref<16x128xf32, #tpu.memory_space<vmem>>, %arg9: memref<16x128xf32, #tpu.memory_space<vmem>>, %arg10: memref<16x128xf32, #tpu.memory_space<vmem>>) attributes {dimension_semantics = [#tpu.dimension_semantics<parallel>, #tpu.dimension_semantics<arbitrary>, #tpu.dimension_semantics<arbitrary>], iteration_bounds = array<i64: 1, 1, 1>, scalar_prefetch = 0 : i64, scratch_operands = 2 : i64, tpu.core_type = #tpu.core_type<tc>, window_params = [{transform_indices = @transform_0, window_bounds = array<i64: 16, 128>}, {transform_indices = @transform_1, window_bounds = array<i64: 128, 128>}, {transform_indices = @transform_2, window_bounds = array<i64: 1, 128>}, {transform_indices = @transform_3, window_bounds = array<i64: 128, 128>}, {transform_indices = @transform_4, window_bounds = array<i64: 128, 128>}, {transform_indices = @transform_5, window_bounds = array<i64: 16, 128>}]} {
    %c0_i32 = arith.constant 0 : i32
    %0 = arith.cmpi eq, %arg2, %c0_i32 : i32
    %1 = arith.extui %0 : i1 to i32
    %c0_i32_0 = arith.constant 0 : i32
    %2 = arith.cmpi ne, %1, %c0_i32_0 : i32
    scf.if %2 {
      %cst_12 = arith.constant 0.000000e+00 : f32
      %15 = vector.broadcast %cst_12 : f32 to vector<16x128xf32>
      %c0_13 = arith.constant 0 : index
      %c0_14 = arith.constant 0 : index
      %16 = vector.load %arg9[%c0_13, %c0_14] : memref<16x128xf32, #tpu.memory_space<vmem>>, vector<16x128xf32>
      tpu.vector_store %arg9[%c0_13, %c0_14], %15 {strides = array<i32>} : memref<16x128xf32, #tpu.memory_space<vmem>>, vector<16x128xf32>,
    } else {
    }
    %c0 = arith.constant 0 : index
    %c0_1 = arith.constant 0 : index
    %3 = vector.load %arg3[%c0, %c0_1] : memref<16x128xf32, #tpu.memory_space<vmem>>, vector<16x128xf32>
    %c0_2 = arith.constant 0 : index
    %c0_3 = arith.constant 0 : index
    %4 = vector.load %arg9[%c0_2, %c0_3] : memref<16x128xf32, #tpu.memory_space<vmem>>, vector<16x128xf32>
    %c0_4 = arith.constant 0 : index
    %c0_5 = arith.constant 0 : index
    %5 = vector.load %arg4[%c0_4, %c0_5] : memref<128x128xf32, #tpu.memory_space<vmem>>, vector<128x128xf32>
    %cst = arith.constant dense<0.000000e+00> : vector<16x128xf32>
    %6 = tpu.matmul %3, %5, %cst {dimension_numbers = #tpu.dot_dimension_numbers<[1], [0], [0], [1], [0, 0, 1, 1], [], []>} : vector<16x128xf32>, vector<128x128xf32>, vector<16x128xf32> -> vector<16x128xf32>
    %7 = arith.addf %4, %6 : vector<16x128xf32>
    %c0_6 = arith.constant 0 : index
    %c0_7 = arith.constant 0 : index
    %8 = vector.load %arg9[%c0_6, %c0_7] : memref<16x128xf32, #tpu.memory_space<vmem>>, vector<16x128xf32>
    tpu.vector_store %arg9[%c0_6, %c0_7], %7 {strides = array<i32>} : memref<16x128xf32, #tpu.memory_space<vmem>>, vector<16x128xf32>,
    %c0_i32_8 = arith.constant 0 : i32
    %9 = arith.cmpi eq, %arg1, %c0_i32_8 : i32
    %10 = arith.extui %9 : i1 to i32
    %c0_i32_9 = arith.constant 0 : i32
    %11 = arith.cmpi ne, %10, %c0_i32_9 : i32
    scf.if %11 {
      %c0_i32_12 = arith.constant 0 : i32
      %15 = arith.cmpi eq, %arg2, %c0_i32_12 : i32
      %16 = arith.extui %15 : i1 to i32
      %c0_i32_13 = arith.constant 0 : i32
      %17 = arith.cmpi ne, %16, %c0_i32_13 : i32
      scf.if %17 {
        %cst_21 = arith.constant 0.000000e+00 : f32
        %23 = vector.broadcast %cst_21 : f32 to vector<16x128xf32>
        %c0_22 = arith.constant 0 : index
        %c0_23 = arith.constant 0 : index
        %24 = vector.load %arg10[%c0_22, %c0_23] : memref<16x128xf32, #tpu.memory_space<vmem>>, vector<16x128xf32>
        tpu.vector_store %arg10[%c0_22, %c0_23], %23 {strides = array<i32>} : memref<16x128xf32, #tpu.memory_space<vmem>>, vector<16x128xf32>,
      } else {
      }
      %c0_14 = arith.constant 0 : index
      %c0_15 = arith.constant 0 : index
      %18 = vector.load %arg10[%c0_14, %c0_15] : memref<16x128xf32, #tpu.memory_space<vmem>>, vector<16x128xf32>
      %c0_16 = arith.constant 0 : index
      %c0_17 = arith.constant 0 : index
      %19 = vector.load %arg6[%c0_16, %c0_17] : memref<128x128xf32, #tpu.memory_space<vmem>>, vector<128x128xf32>
      %cst_18 = arith.constant dense<0.000000e+00> : vector<16x128xf32>
      %20 = tpu.matmul %3, %19, %cst_18 {dimension_numbers = #tpu.dot_dimension_numbers<[1], [0], [0], [1], [0, 0, 1, 1], [], []>} : vector<16x128xf32>, vector<128x128xf32>, vector<16x128xf32> -> vector<16x128xf32>
      %21 = arith.addf %18, %20 : vector<16x128xf32>
      %c0_19 = arith.constant 0 : index
      %c0_20 = arith.constant 0 : index
      %22 = vector.load %arg10[%c0_19, %c0_20] : memref<16x128xf32, #tpu.memory_space<vmem>>, vector<16x128xf32>
      tpu.vector_store %arg10[%c0_19, %c0_20], %21 {strides = array<i32>} : memref<16x128xf32, #tpu.memory_space<vmem>>, vector<16x128xf32>,
    } else {
    }
    %c0_i32_10 = arith.constant 0 : i32
    %12 = arith.cmpi eq, %arg2, %c0_i32_10 : i32
    %13 = arith.extui %12 : i1 to i32
    %c0_i32_11 = arith.constant 0 : i32
    %14 = arith.cmpi ne, %13, %c0_i32_11 : i32
    scf.if %14 {
      %c0_12 = arith.constant 0 : index
      %c0_13 = arith.constant 0 : index
      %15 = vector.load %arg10[%c0_12, %c0_13] : memref<16x128xf32, #tpu.memory_space<vmem>>, vector<16x128xf32>
      %c0_14 = arith.constant 0 : index
      %c0_15 = arith.constant 0 : index
      %16 = vector.load %arg7[%c0_14, %c0_15] : memref<128x128xf32, #tpu.memory_space<vmem>>, vector<128x128xf32>
      %cst_16 = arith.constant dense<0.000000e+00> : vector<16x128xf32>
      %17 = tpu.matmul %15, %16, %cst_16 {dimension_numbers = #tpu.dot_dimension_numbers<[1], [0], [0], [1], [0, 0, 1, 1], [], []>} : vector<16x128xf32>, vector<128x128xf32>, vector<16x128xf32> -> vector<16x128xf32>
      %c0_17 = arith.constant 0 : index
      %c0_18 = arith.constant 0 : index
      %18 = vector.load %arg9[%c0_17, %c0_18] : memref<16x128xf32, #tpu.memory_space<vmem>>, vector<16x128xf32>
      %c0_19 = arith.constant 0 : index
      %c0_20 = arith.constant 0 : index
      %19 = vector.load %arg5[%c0_19, %c0_20] : memref<1x128xf32, #tpu.memory_space<vmem>>, vector<1x128xf32>
      %20 = vector.broadcast %19 : vector<1x128xf32> to vector<16x128xf32>
      %21 = arith.addf %18, %20 : vector<16x128xf32>
      %22 = arith.addf %21, %17 : vector<16x128xf32>
      %c0_21 = arith.constant 0 : index
      %c0_22 = arith.constant 0 : index
      %23 = vector.load %arg8[%c0_21, %c0_22] : memref<16x128xf32, #tpu.memory_space<vmem>>, vector<16x128xf32>
      tpu.vector_store %arg8[%c0_21, %c0_22], %22 {strides = array<i32>} : memref<16x128xf32, #tpu.memory_space<vmem>>, vector<16x128xf32>,
    } else {
    }
    return
  }
  func.func @transform_0(%arg0: i32, %arg1: i32, %arg2: i32) -> (i32, i32) {
    %c0_i32 = arith.constant 0 : i32
    return %arg0, %arg2 : i32, i32
  }
  func.func @transform_1(%arg0: i32, %arg1: i32, %arg2: i32) -> (i32, i32) {
    %c0_i32 = arith.constant 0 : i32
    return %arg2, %arg1 : i32, i32
  }
  func.func @transform_2(%arg0: i32, %arg1: i32, %arg2: i32) -> (i32, i32) {
    %c0_i32 = arith.constant 0 : i32
    %c0_i32_0 = arith.constant 0 : i32
    return %c0_i32, %arg1 : i32, i32
  }
  func.func @transform_3(%arg0: i32, %arg1: i32, %arg2: i32) -> (i32, i32) {
    %c0_i32 = arith.constant 0 : i32
    %c0_i32_0 = arith.constant 0 : i32
    return %arg2, %c0_i32 : i32, i32
  }
  func.func @transform_4(%arg0: i32, %arg1: i32, %arg2: i32) -> (i32, i32) {
    %c0_i32 = arith.constant 0 : i32
    %c0_i32_0 = arith.constant 0 : i32
    return %c0_i32, %arg1 : i32, i32
  }
  func.func @transform_5(%arg0: i32, %arg1: i32, %arg2: i32) -> (i32, i32) {
    %c0_i32 = arith.constant 0 : i32
    return %arg0, %arg1 : i32, i32
  }
}

</mosaic_0001>

<bundles_post_ra>
// kernel: tpu_custom_call.1
= control target key start
LH: loop header
LB: loop body
LE: loop exit
PB: predicated region body
PF: predicated region fallthrough
CT: control target
= control target key end

     0   :  { %10 = vsyncpa [#allocation5], 0  ;;  %s490_s0 = inlined_call_operand.hbm [shape: f32[16,128], index: 0, kind: input, shape index: {}]   ;;  %s491_s1 = inlined_call_operand.hbm [shape: f32[128,128], index: 1, kind: input, shape index: {}]   ;;  %s492_s2 = inlined_call_operand.vmem [shape: f32[1,128], index: 2, kind: input, shape index: {}]   ;;  %s493_s3 = inlined_call_operand.hbm [shape: f32[128,128], index: 3, kind: input, shape index: {}]   ;;  %s494_s4 = inlined_call_operand.hbm [shape: f32[128,128], index: 4, kind: input, shape index: {}]   ;;  %s495_s5 = inlined_call_operand.hbm [shape: f32[16,128], index: 5, kind: output, shape index: {}]  }
   0x1   :  { %11 = vsyncpa [#allocation8], 0 }
   0x2   :  { %12 = vsyncpa [#allocation11], 0 }
   0x3   :  { %13 = vsyncpa [#allocation6], 0  ;;  %s31_s20 = sshll.u32 %s491_s1, 4  ;;  %s420_s21 = smov [#allocation7]   ;;  %s32_s20 = int_to_ptr.hbm [resolvable:$true] %s31_s20 }
   0x4   :  { %s33_s22 = sshll.u32 %s420_s21, 4  ;;  %s18_s25 = sshll.u32 %s490_s0, 4  ;;  %s34_s22 = int_to_ptr.vmem [resolvable:$true] %s33_s22  ;;  %s19_s25 = int_to_ptr.hbm [resolvable:$true] %s18_s25 }
   0x5   :  { %s421_s26 = smov 128   ;;  %s422_s27 = smov 8  }
   0x6   :  { %39 = dma.hbm_to_vmem [thread:$0]  %s32_s20, 2048, %s34_s22, [#allocation8], %s421_s26, %s421_s26, %s422_s27  }
   0x7   :  { %s423_s28 = smov [#allocation4]   ;;  %s46_s1 = sshll.u32 %s493_s3, 4  ;;  %s47_s1 = int_to_ptr.hbm [resolvable:$true] %s46_s1 }
   0x8   :  { %s20_s29 = sshll.u32 %s423_s28, 4  ;;  %s59_s8 = sshll.u32 %s494_s4, 4  ;;  %s21_s29 = int_to_ptr.vmem [resolvable:$true] %s20_s29  ;;  %s60_s8 = int_to_ptr.hbm [resolvable:$true] %s59_s8 }
   0x9   :  { %26 = dma.hbm_to_vmem [thread:$0]  %s19_s25, 256, %s21_s29, [#allocation5], %s421_s26, %s421_s26, %s422_s27  }
   0xa   :  { %s424_s9 = smov [#allocation9]   ;;  %s425_s11 = smov [#allocation10]  }
   0xb   :  { %s48_s10 = sshll.u32 %s424_s9, 4  ;;  %s61_s3 = sshll.u32 %s425_s11, 4  ;;  %s49_s10 = int_to_ptr.vmem [resolvable:$true] %s48_s10  ;;  %s62_s3 = int_to_ptr.vmem [resolvable:$true] %s61_s3 }
   0xc   :  { %54 = dma.hbm_to_vmem [thread:$0]  %s47_s1, 2048, %s49_s10, [#allocation8], %s421_s26, %s421_s26, %s422_s27  }
   0xd   :  { %67 = dma.hbm_to_vmem [thread:$0]  %s60_s8, 2048, %s62_s3, [#allocation11], %s421_s26, %s421_s26, %s422_s27  }
   0xe   :  { %412 = dma.done.wait [#allocation5], 256  }
   0xf   :  { %413 = vsyncadd [#allocation5], 4294967040 }
  0x10   :  { %414 = dma.done.wait [#allocation8], 4096  }
  0x11   :  { %415 = vsyncadd [#allocation8], 4294963200 }
  0x12   :  { %416 = dma.done.wait [#allocation11], 2048  }
  0x13   :  { %417 = vsyncadd [#allocation11], 4294965248  ;;  %v163_v0 = vld [vmem:[#allocation9 + $0x78] sm:$0xff]  ;;  %v162_v1 = vld [vmem:[#allocation9 + $0x70] sm:$0xff]  ;;  %s426_s13 = smov [#allocation12]   ;;  %s253_s17 = sshll.u32 %s495_s5, 4  ;;  %s254_s17 = int_to_ptr.hbm [resolvable:$true] %s253_s17 }
  0x14   :  { %164 = vmatpush.msra.mxu1 %v163_v0  ;;  %v161_v2 = vld [vmem:[#allocation9 + $0x68] sm:$0xff]  ;;  %v160_v3 = vld [vmem:[#allocation9 + $0x60] sm:$0xff]  ;;  %v159_v4 = vld [vmem:[#allocation9 + $0x58] sm:$0xff]  ;;  %s251_s14 = sshll.u32 %s426_s13, 4  ;;  %s252_s14 = int_to_ptr.vmem [resolvable:$true] %s251_s14 }
  0x15   :  { %v158_v5 = vld [vmem:[#allocation9 + $0x50] sm:$0xff]  ;;  %v211_v6 = vld [vmem:[#allocation10 + $0x78] sm:$0xff]  ;;  %v157_v10 = vld [vmem:[#allocation9 + $0x48] sm:$0xff] }
  0x16   :  { %165 = vmatpush.msra.mxu1 %v162_v1  ;;  %v210_v7 = vld [vmem:[#allocation10 + $0x70] sm:$0xff]  ;;  %v109_v8 = vld [vmem:[#allocation7 + $0x78] sm:$0xff]  ;;  %212 = vmatpush.msra.mxu2 %v211_v6  ;;  %v209_v11 = vld [vmem:[#allocation10 + $0x68] sm:$0xff] }
  0x17   :  { %v108_v9 = vld [vmem:[#allocation7 + $0x70] sm:$0xff]  ;;  %110 = vmatpush.msra.mxu0 %v109_v8  ;;  %268 = vmatpush.msra.mxu3 %v109_v8  ;;  %v107_v12 = vld [vmem:[#allocation7 + $0x68] sm:$0xff]  ;;  %v156_v13 = vld [vmem:[#allocation9 + $0x40] sm:$0xff] }
  0x18   :  { %166 = vmatpush.msra.mxu1 %v161_v2  ;;  %213 = vmatpush.msra.mxu2 %v210_v7  ;;  %v208_v14 = vld [vmem:[#allocation10 + $0x60] sm:$0xff]  ;;  %v155_v16 = vld [vmem:[#allocation9 + $0x38] sm:$0xff]  ;;  %v154_v19 = vld [vmem:[#allocation9 + $0x30] sm:$0xff] }
  0x19   :  { %111 = vmatpush.msra.mxu0 %v108_v9  ;;  %269 = vmatpush.msra.mxu3 %v108_v9  ;;  %v106_v15 = vld [vmem:[#allocation7 + $0x60] sm:$0xff]  ;;  %v207_v17 = vld [vmem:[#allocation10 + $0x58] sm:$0xff]  ;;  %v206_v20 = vld [vmem:[#allocation10 + $0x50] sm:$0xff] }
  0x1a   :  { %167 = vmatpush.msra.mxu1 %v160_v3  ;;  %214 = vmatpush.msra.mxu2 %v209_v11  ;;  %v105_v18 = vld [vmem:[#allocation7 + $0x58] sm:$0xff]  ;;  %v104_v21 = vld [vmem:[#allocation7 + $0x50] sm:$0xff]  ;;  %v153_v22 = vld [vmem:[#allocation9 + $0x28] sm:$0xff] }
  0x1b   :  { %112 = vmatpush.msra.mxu0 %v107_v12  ;;  %270 = vmatpush.msra.mxu3 %v107_v12  ;;  %v205_v23 = vld [vmem:[#allocation10 + $0x48] sm:$0xff]  ;;  %v152_v25 = vld [vmem:[#allocation9 + $0x20] sm:$0xff]  ;;  %v151_v28 = vld [vmem:[#allocation9 + $0x18] sm:$0xff] }
  0x1c   :  { %168 = vmatpush.msra.mxu1 %v159_v4  ;;  %215 = vmatpush.msra.mxu2 %v208_v14  ;;  %v103_v24 = vld [vmem:[#allocation7 + $0x48] sm:$0xff]  ;;  %v204_v26 = vld [vmem:[#allocation10 + $0x40] sm:$0xff]  ;;  %v203_v29 = vld [vmem:[#allocation10 + $0x38] sm:$0xff] }
  0x1d   :  { %113 = vmatpush.msra.mxu0 %v106_v15  ;;  %271 = vmatpush.msra.mxu3 %v106_v15  ;;  %v102_v27 = vld [vmem:[#allocation7 + $0x40] sm:$0xff]  ;;  %v101_v30 = vld [vmem:[#allocation7 + $0x38] sm:$0xff]  ;;  %v150_v31 = vld [vmem:[#allocation9 + $0x10] sm:$0xff] }
  0x1e   :  { %169 = vmatpush.msra.mxu1 %v158_v5  ;;  %216 = vmatpush.msra.mxu2 %v207_v17  ;;  %v202_v32 = vld [vmem:[#allocation10 + $0x30] sm:$0xff]  ;;  %v149_v34 = vld [vmem:[#allocation9 + $0x8] sm:$0xff]  ;;  %v148_v37 = vld [vmem:[#allocation9] sm:$0xff] }
  0x1f   :  { %114 = vmatpush.msra.mxu0 %v105_v18  ;;  %272 = vmatpush.msra.mxu3 %v105_v18  ;;  %v100_v33 = vld [vmem:[#allocation7 + $0x30] sm:$0xff]  ;;  %v201_v35 = vld [vmem:[#allocation10 + $0x28] sm:$0xff]  ;;  %v200_v38 = vld [vmem:[#allocation10 + $0x20] sm:$0xff] }
  0x20   :  { %170 = vmatpush.msra.mxu1 %v157_v10  ;;  %217 = vmatpush.msra.mxu2 %v206_v20  ;;  %v99_v36 = vld [vmem:[#allocation7 + $0x28] sm:$0xff]  ;;  %v90_v39 = vld [vmem:[#allocation4] sm:$0xff]  ;;  %v98_v40 = vld [vmem:[#allocation7 + $0x20] sm:$0xff] }
  0x21   :  { %115 = vmatpush.msra.mxu0 %v104_v21  ;;  %273 = vmatpush.msra.mxu3 %v104_v21  ;;  %v199_v41 = vld [vmem:[#allocation10 + $0x18] sm:$0xff]  ;;  %v198_v43 = vld [vmem:[#allocation10 + $0x10] sm:$0xff]  ;;  %v197_v45 = vld [vmem:[#allocation10 + $0x8] sm:$0xff] }
  0x22   :  { %171 = vmatpush.msra.mxu1 %v156_v13  ;;  %218 = vmatpush.msra.mxu2 %v205_v23  ;;  %v97_v42 = vld [vmem:[#allocation7 + $0x18] sm:$0xff]  ;;  %v96_v44 = vld [vmem:[#allocation7 + $0x10] sm:$0xff]  ;;  %v196_v47 = vld [vmem:[#allocation10] sm:$0xff] }
  0x23   :  { %116 = vmatpush.msra.mxu0 %v103_v24  ;;  %274 = vmatpush.msra.mxu3 %v103_v24  ;;  %v91_v46 = vld [vmem:[#allocation4 + $0x8] sm:$0xff]  ;;  %v95_v48 = vld [vmem:[#allocation7 + $0x8] sm:$0xff]  ;;  %v94_v49 = vld [vmem:[#allocation7] sm:$0xff] }
  0x24   :  { %172 = vmatpush.msra.mxu1 %v155_v16  ;;  %219 = vmatpush.msra.mxu2 %v204_v26  ;;  %v291_v52 = vld [vmem:[%s492_s2] ss:$0 sm:$0xff] }
  0x25   :  { %117 = vmatpush.msra.mxu0 %v102_v27  ;;  %275 = vmatpush.msra.mxu3 %v102_v27 }
  0x26   :  { %173 = vmatpush.msra.mxu1 %v154_v19  ;;  %220 = vmatpush.msra.mxu2 %v203_v29 }
  0x27   :  { %118 = vmatpush.msra.mxu0 %v101_v30  ;;  %276 = vmatpush.msra.mxu3 %v101_v30 }
  0x28   :  { %174 = vmatpush.msra.mxu1 %v153_v22  ;;  %221 = vmatpush.msra.mxu2 %v202_v32 }
  0x29   :  { %119 = vmatpush.msra.mxu0 %v100_v33  ;;  %277 = vmatpush.msra.mxu3 %v100_v33 }
  0x2a   :  { %175 = vmatpush.msra.mxu1 %v152_v25  ;;  %222 = vmatpush.msra.mxu2 %v201_v35 }
  0x2b   :  { %120 = vmatpush.msra.mxu0 %v99_v36  ;;  %278 = vmatpush.msra.mxu3 %v99_v36 }
  0x2c   :  { %176 = vmatpush.msra.mxu1 %v151_v28  ;;  %223 = vmatpush.msra.mxu2 %v200_v38 }
  0x2d   :  { %121 = vmatpush.msra.mxu0 %v98_v40  ;;  %279 = vmatpush.msra.mxu3 %v98_v40 }
  0x2e   :  { %177 = vmatpush.msra.mxu1 %v150_v31  ;;  %224 = vmatpush.msra.mxu2 %v199_v41 }
  0x2f   :  { %122 = vmatpush.msra.mxu0 %v97_v42  ;;  %280 = vmatpush.msra.mxu3 %v97_v42 }
  0x30   :  { %178 = vmatpush.msra.mxu1 %v149_v34  ;;  %225 = vmatpush.msra.mxu2 %v198_v43 }
  0x31   :  { %123 = vmatpush.msra.mxu0 %v96_v44  ;;  %281 = vmatpush.msra.mxu3 %v96_v44 }
  0x32   :  { %179 = vmatpush.msra.mxu1 %v148_v37  ;;  %226 = vmatpush.msra.mxu2 %v197_v45 }
  0x33   :  { %180 = vmatmul.f32.vlgmr.msra.gmra.mxu1 %v90_v39  ;;  %124 = vmatpush.msra.mxu0 %v95_v48 }
  0x34   :  { %227 = vmatpush.msra.mxu2 %v196_v47  ;;  %282 = vmatpush.msra.mxu3 %v95_v48 }
  0x35   :  { %125 = vmatpush.msra.mxu0 %v94_v49 }
  0x36   :  { %283 = vmatpush.msra.mxu3 %v94_v49  ;;  %126 = vmatmul.f32.vlgmr.msra.gmra.mxu0 %v90_v39 }
  0x37   :  { %129 = vmatmul.f32.vlgmr.msra.gmra.mxu3 %v91_v46 }
  0x3b   :  { %183 = vmatmul.f32.gmra.mxu1 %v91_v46 }
  0xb0   :  { %v181_v50 = vpop.f32.mrf.mxu1 }
  0xb1   :  { %228 = vmatmul.f32.vlgmr.msra.gmra.mxu2 %v181_v50 }
  0xb3   :  { %v127_v53 = vpop.f32.mrf.mxu0 }
  0xb4   :  { %v241_v54 = vadd.f32 %v291_v52, %v127_v53 }
  0xb8   :  { %v184_v51 = vpop.f32.mrf.mxu1 }
  0xb9   :  { %231 = vmatmul.f32.gmra.mxu2 %v184_v51 }
  0xba   :  { %v130_v57 = vpop.f32.mrf.mxu3 }
  0xbb   :  { %v242_v58 = vadd.f32 %v291_v52, %v130_v57 }
 0x134   :  { %v229_v55 = vpop.f32.mrf.mxu2 }
 0x135   :  { %v243_v56 = vadd.f32 %v241_v54, %v229_v55 }
 0x137   :  { %245 = vst [vmem:[#allocation12] sm:$0xff] %v243_v56 }
 0x13c   :  { %v232_v59 = vpop.f32.mrf.mxu2 }
 0x13d   :  { %v244_v60 = vadd.f32 %v242_v58, %v232_v59 }
 0x13f   :  { %246 = vst [vmem:[#allocation12 + $0x8] sm:$0xff] %v244_v60 }
 0x140   :  { %259 = dma.vmem_to_hbm [thread:$0]  %s252_s14, 256, %s254_s17, [#allocation6], %s421_s26, %s421_s26, %s422_s27  }
 0x141   :  { %418 = dma.done.wait [#allocation6], 256  }
 0x142   :  { %419 = vsyncadd [#allocation6], 4294967040 }
 0x143   :  { %264 = vsyncpa [#allocation5], 1 }
 0x144   :  { %265 = vsyncpa [#allocation8], 1 }
 0x145   :  { %266 = vsyncpa [#allocation11], 1 }
 0x146   :  { %267 = vsyncpa [#allocation6], 1 }

</bundles_post_ra>
